<compile_context>
chip_gen: v5e
topology: v5e:2x2
jax: 0.10.0
libtpu: 0.0.40
codegen_flags: <defaults>
</compile_context>

<pallas_src>
import jax
import jax.numpy as jnp
from jax.experimental import pallas as pl
from jax.experimental.pallas import tpu as pltpu


def conv1x1_kernel(x_ref, w_ref, b_ref, o_ref):
    # x_ref: (1, Cin, tS)   w_ref: (Cout, Cin)   b_ref: (Cout, 1)
    # o_ref: (1, Cout, tS)
    acc = jnp.dot(w_ref[...], x_ref[0],
                  preferred_element_type=jnp.float32)        # MXU, f32 accumulate
    o_ref[0] = (acc + b_ref[...].astype(jnp.float32)).astype(o_ref.dtype)


def conv1x1(x_nchw, weight, bias, *, spatial_tile=1024):
    """1x1 conv, stride 1, padding 0.

    x_nchw: (N, Cin, H, W)
    weight: (Cout, Cin, 1, 1)   (PyTorch layout)
    bias:   (Cout,)
    returns (N, Cout, H, W)
    """
    N, Cin, H, W = x_nchw.shape
    Cout = weight.shape[0]
    HW = H * W
    assert spatial_tile % 128 == 0, "spatial_tile must be a multiple of 128"

    # Free (view-only) reshapes — no transposes, no extra HBM passes.
    x3 = x_nchw.reshape(N, Cin, HW)
    w_mat = weight.reshape(Cout, Cin).astype(x_nchw.dtype)
    b_col = bias.reshape(Cout, 1)

    # Spatial tile: whole row if small, else a 128-multiple tile.  A ragged
    # last block is handled by Pallas' OOB read-padding / write-masking.
    tS = HW if HW <= spatial_tile else spatial_tile
    grid = (N, pl.cdiv(HW, tS))

    itemsize = jnp.dtype(x_nchw.dtype).itemsize
    cost = pl.CostEstimate(
        flops=2 * N * HW * Cin * Cout,
        transcendentals=0,
        bytes_accessed=(N * Cin * HW * itemsize          # x read
                        + Cout * Cin * itemsize          # weight read
                        + Cout * b_col.dtype.itemsize    # bias read
                        + N * Cout * HW * itemsize),     # out write
    )

    out3 = pl.pallas_call(
        conv1x1_kernel,
        out_shape=jax.ShapeDtypeStruct((N, Cout, HW), x_nchw.dtype),
        grid_spec=pltpu.PrefetchScalarGridSpec(
            num_scalar_prefetch=0,
            grid=grid,
            in_specs=[
                pl.BlockSpec((1, Cin, tS), lambda n, s: (n, 0, s)),
                pl.BlockSpec((Cout, Cin), lambda n, s: (0, 0)),
                pl.BlockSpec((Cout, 1), lambda n, s: (0, 0)),
            ],
            out_specs=pl.BlockSpec((1, Cout, tS), lambda n, s: (n, 0, s)),
        ),
        compiler_params=pltpu.CompilerParams(
            dimension_semantics=("parallel", "parallel")),
        cost_estimate=cost,
    )(x3, w_mat, b_col)

    return out3.reshape(N, Cout, H, W)


if __name__ == "__main__":
    # Note: `print(x.requires_grad)` in the PyTorch forward is a host-side
    # debug print with no numerical effect; it is intentionally omitted.
    key = jax.random.PRNGKey(0)
    k_x, k_w, k_b = jax.random.split(key, 3)

    N, Cin, H, W = 2, 128, 8, 8     # Cin fixed at 128 by the module
    Cout = 64

    x = jax.random.normal(k_x, (N, Cin, H, W), dtype=jnp.float32)
    # Deterministic params mimicking PyTorch's uniform(-1/sqrt(fan_in), +) init.
    bound = 1.0 / jnp.sqrt(float(Cin))
    weight = jax.random.uniform(k_w, (Cout, Cin, 1, 1), minval=-bound,
                                maxval=bound, dtype=jnp.float32)
    bias = jax.random.uniform(k_b, (Cout,), minval=-bound, maxval=bound,
                              dtype=jnp.float32)

    out = conv1x1(x, weight, bias)
    jax.block_until_ready(out)

    # Sanity check against a plain-JAX reference.
    ref = jnp.einsum("nchw,oc->nohw", x, weight.reshape(Cout, Cin)) \
        + bias.reshape(1, Cout, 1, 1)
    assert out.shape == (N, Cout, H, W)
    assert jnp.allclose(out, ref, atol=1e-4, rtol=1e-4)

    print("KERNEL_OK")
</pallas_src>

<mosaic_0001>
module attributes {stable_mosaic.version = 11 : i64} {
  func.func @conv1x1_kernel(%arg0: i32, %arg1: i32, %arg2: memref<1x128x64xf32, #tpu.memory_space<vmem>>, %arg3: memref<64x128xf32, #tpu.memory_space<vmem>>, %arg4: memref<64x1xf32, #tpu.memory_space<vmem>>, %arg5: memref<1x64x64xf32, #tpu.memory_space<vmem>>) attributes {dimension_semantics = [#tpu.dimension_semantics<parallel>, #tpu.dimension_semantics<parallel>], iteration_bounds = array<i64: 2, 1>, scalar_prefetch = 0 : i64, scratch_operands = 0 : i64, tpu.core_type = #tpu.core_type<tc>, window_params = [{transform_indices = @transform_0, window_bounds = array<i64: 1, 128, 64>}, {pipeline_mode = #tpu.pipeline_mode<synchronous>, transform_indices = @transform_1, window_bounds = array<i64: 64, 128>}, {pipeline_mode = #tpu.pipeline_mode<synchronous>, transform_indices = @transform_2, window_bounds = array<i64: 64, 1>}, {transform_indices = @transform_3, window_bounds = array<i64: 1, 64, 64>}]} {
    %c0 = arith.constant 0 : index
    %c0_0 = arith.constant 0 : index
    %0 = vector.load %arg3[%c0, %c0_0] : memref<64x128xf32, #tpu.memory_space<vmem>>, vector<64x128xf32>
    %c0_1 = arith.constant 0 : index
    %c0_2 = arith.constant 0 : index
    %c0_3 = arith.constant 0 : index
    %1 = vector.load %arg2[%c0_1, %c0_2, %c0_3] : memref<1x128x64xf32, #tpu.memory_space<vmem>>, vector<1x128x64xf32>
    %2 = vector.shape_cast %1 : vector<1x128x64xf32> to vector<128x64xf32>
    %cst = arith.constant dense<0.000000e+00> : vector<64x64xf32>
    %3 = tpu.matmul %0, %2, %cst {dimension_numbers = #tpu.dot_dimension_numbers<[1], [0], [0], [1], [0, 0, 1, 1], [], []>} : vector<64x128xf32>, vector<128x64xf32>, vector<64x64xf32> -> vector<64x64xf32>
    %c0_4 = arith.constant 0 : index
    %c0_5 = arith.constant 0 : index
    %4 = vector.load %arg4[%c0_4, %c0_5] : memref<64x1xf32, #tpu.memory_space<vmem>>, vector<64x1xf32>
    %5 = vector.broadcast %4 : vector<64x1xf32> to vector<64x64xf32>
    %6 = arith.addf %3, %5 : vector<64x64xf32>
    %c0_6 = arith.constant 0 : index
    %c0_7 = arith.constant 0 : index
    %c0_8 = arith.constant 0 : index
    %7 = vector.load %arg5[%c0_6, %c0_7, %c0_8] : memref<1x64x64xf32, #tpu.memory_space<vmem>>, vector<1x64x64xf32>
    %8 = vector.shape_cast %7 : vector<1x64x64xf32> to vector<64x64xf32>
    %9 = vector.shape_cast %6 : vector<64x64xf32> to vector<1x64x64xf32>
    tpu.vector_store %arg5[%c0_6, %c0_7, %c0_8], %9 {strides = array<i32>} : memref<1x64x64xf32, #tpu.memory_space<vmem>>, vector<1x64x64xf32>,
    return
  }
  func.func @transform_0(%arg0: i32, %arg1: i32) -> (i32, i32, i32) {
    %c0_i32 = arith.constant 0 : i32
    %c0_i32_0 = arith.constant 0 : i32
    return %arg0, %c0_i32, %arg1 : i32, i32, i32
  }
  func.func @transform_1(%arg0: i32, %arg1: i32) -> (i32, i32) {
    %c0_i32 = arith.constant 0 : i32
    %c0_i32_0 = arith.constant 0 : i32
    %c0_i32_1 = arith.constant 0 : i32
    return %c0_i32, %c0_i32_0 : i32, i32
  }
  func.func @transform_2(%arg0: i32, %arg1: i32) -> (i32, i32) {
    %c0_i32 = arith.constant 0 : i32
    %c0_i32_0 = arith.constant 0 : i32
    %c0_i32_1 = arith.constant 0 : i32
    return %c0_i32, %c0_i32_0 : i32, i32
  }
  func.func @transform_3(%arg0: i32, %arg1: i32) -> (i32, i32, i32) {
    %c0_i32 = arith.constant 0 : i32
    %c0_i32_0 = arith.constant 0 : i32
    return %arg0, %c0_i32, %arg1 : i32, i32, i32
  }
}

</mosaic_0001>

<bundles_post_ra>
// kernel: tpu_custom_call.1
= control target key start
LH: loop header
LB: loop body
LE: loop exit
PB: predicated region body
PF: predicated region fallthrough
CT: control target
= control target key end

     0   :  { %8 = vsyncpa [#allocation3], 0  ;;  %s824_s0 = inlined_call_operand.vmem [shape: f32[2,128,64], index: 0, kind: input, shape index: {}]   ;;  %s825_s1 = inlined_call_operand.vmem [shape: f32[64,128], index: 1, kind: input, shape index: {}]   ;;  %s826_s2 = inlined_call_operand.vmem [shape: f32[64,1], index: 2, kind: input, shape index: {}]   ;;  %s827_s3 = inlined_call_operand.hbm [shape: f32[2,64,64], index: 3, kind: output, shape index: {}]  }
   0x1   :  { %10 = vsyncpa [#allocation3 + $0x1], 0  ;;  %s638_s12 = smov 0   ;;  %s640_s13 = smov 0  }
   0x2   :  { %s642_s14 = smov 0   ;;  %s644_s15 = smov 0  }
   0x3   :  { %s646_s16 = smov 0   ;;  %s648_s17 = smov 0  }
   0x4 LB: > { %s411_s18 = sadd.s32 4294967295, %s613_s17   ;;  %s412_s19 = sadd.s32 4294967294, %s613_s17   ;;  %s613_s17 = sphi %s648_s17, %s16_s17   ;;  %s609_s16 = sphi %s646_s16, %s834_s16   ;;  %s605_s15 = sphi %s644_s15, %s833_s15   ;;  %s601_s14 = sphi %s642_s14, %s832_s14   ;;  %s597_s13 = sphi %s640_s13, %s831_s13   ;;  %s593_s12 = sphi %s638_s12, %s830_s12  }
   0x5   : > { %s28_s20 = sadd.s32 1, %s609_s16  ;;  %s107_s21 = sadd.s32 1, %s601_s14 }
   0x6   : > { %p30_p0 = scmp.ge.s32.totalorder %s28_s20, 2  ;;  %p117_p1 = scmp.ne.s32.totalorder %s601_s14, %s597_s13 }
   0x7   : > { %p118_p2 = scmp.eq.s32.totalorder %s411_s18, 1  ;;  %p123_p3 = scmp.ne.s32.totalorder %s597_s13, %s593_s12 }
   0x8   : > { %s836_s20 = smov (%p30_p0, %s28_s20), 0  ;;  %p124_p5 = scmp.eq.s32.totalorder %s412_s19, 1 }
   0x9   : > { %p678_p4 = por %p118_p2, %p117_p1  ;;  %s102_s23 = ssub.s32 %s609_s16, %s836_s20 }
   0xa   : > { %p415_p6 = scmp.ge.s32.totalorder %s613_s17, 1  ;;  %p105_p7 = scmp.eq.s32.totalorder %s102_s23, 0 }
   0xb   : > { %p685_p8 = por %p124_p5, %p123_p3  ;;  %p159_p9 = scmp.lt.s32.totalorder %s613_s17, 3 }
   0xc   : > { %s691_s25 = scalar_select %p105_p7, %s601_s14, %s107_s21  }
   0xd   : > { %p160_p10 = pnand %p415_p6, %p159_p9 }
   0xe   : > { %p186_p11 = scmp.lt.s32.totalorder (!%p160_p10), %s605_s15, 1  ;;  %s183_s29 = sand.u32 (!%p160_p10), 1, %s597_s13  }
   0xf   : > { %163 = sbr.rel (%p160_p10) target bundleno = 205 (0xcd), region = 32  ;;  %s425_s5 = sshll.u32 (!%p160_p10), %s605_s15, 6 }
  0x10   : > { %s329_s8 = scalar_lea.hbm (!%p160_p10), %s827_s3, %s425_s5  ;;  %s317_s10 = scalar_lea.sflag (!%p160_p10), [#allocation3], %s183_s29 }
  0x11   : > { %s332_s9 = sshll.u32 (!%p160_p10), %s329_s8, 4  ;;  %s555_s23 = scalar_lea.hbm (!%p160_p10), %s827_s3, 128  ;;  %s333_s9 = int_to_ptr.hbm [resolvable:$true] %s332_s9 }
  0x12   : > { %s549_s11 = sshra.s32 (!%p160_p10), %s333_s9, 4  ;;  %s550_s11 = int_to_ptr.hbm [resolvable:$true] %s549_s11 }
  0x13   : > { %s551_s18 = scalar_lea.hbm (!%p160_p10), %s550_s11, 64  ;;  %p556_p1 = scmp.lt.s32.totalorder (!%p160_p10), %s550_s11, %s827_s3 }
  0x14   : > { %v220_v0 = vld [vmem:[%s826_s2 + $0x10] sm:$0xff]  ;;  %v218_v1 = vld [vmem:[%s826_s2] sm:$0xff]  ;;  %v615_v2 = vmov 0   ;;  %s187_s30 = scalar_select %p186_p11, %s605_s15, 1  ;;  %v221_v23 = vld [vmem:[%s826_s2 + $0x18] sm:$0xff]  ;;  %vm307_vm0 = vcmask 523264  }
  0x15   : > { %533 = vset.pattern.permute.xlu1 %v615_v2  ;;  %532 = vset.pattern.permute.xlu0 %v615_v2  ;;  %v194_v19 = vld [vmem:[%s825_s1] sm:$0xff]  ;;  %v196_v20 = vld [vmem:[%s825_s1 + $0x10] sm:$0xff]  ;;  %v219_v24 = vld [vmem:[%s826_s2 + $0x8] sm:$0xff]  ;;  %p552_p12 = scmp.ne.s32.totalorder %s550_s11, %s551_s18  ;;  %p557_p2 = scmp.lt.s32.totalorder %s555_s23, %s551_s18 }
  0x16   : > { %238 = vperm.xlu1 %533, %v220_v0   ;;  %228 = vperm.xlu0 %532, %v218_v1   ;;  %s424_s4 = sshll.u32 %s187_s30, 7  ;;  %v198_v21 = vld [vmem:[%s825_s1 + $0x20] sm:$0xff]  ;;  %v200_v22 = vld [vmem:[%s825_s1 + $0x30] sm:$0xff]  ;;  %v195_v26 = vld [vmem:[%s825_s1 + $0x8] sm:$0xff]  ;;  %s416_s30 = sshll.u32 %s183_s29, 6 }
  0x17   : > { %534 = vset.pattern.permute.xlu2 %v615_v2  ;;  %s704_s7 = scalar_lea.vmem %s824_s0, %s424_s4  ;;  %v222_v25 = vld [vmem:[%s826_s2 + $0x20] sm:$0xff]  ;;  %v197_v27 = vld [vmem:[%s825_s1 + $0x18] sm:$0xff]  ;;  %v199_v28 = vld [vmem:[%s825_s1 + $0x28] sm:$0xff]  ;;  %s767_s4 = scalar_lea.vmem [#allocation2], %s416_s30 }
  0x18   : > { %v217_v3 = vld [vmem:[%s704_s7 + $0x78] sm:$0xff]  ;;  %v216_v4 = vld [vmem:[%s704_s7 + $0x70] sm:$0xff]  ;;  %v215_v5 = vld [vmem:[%s704_s7 + $0x68] sm:$0xff]  ;;  %248 = vperm.xlu2 %534, %v222_v25   ;;  %s330_s15 = sshll.u32 %s767_s4, 4  ;;  %p553_p13 = pnand %p552_p12, %p678_p4  ;;  %s331_s15 = int_to_ptr.vmem [resolvable:$true] %s330_s15 }
  0x19   : > { %266 = vmatpush.msra.mxu0 %v217_v3  ;;  %426 = vmatpush.msra.mxu1 %v217_v3  ;;  %v214_v6 = vld [vmem:[%s704_s7 + $0x60] sm:$0xff]  ;;  %v213_v7 = vld [vmem:[%s704_s7 + $0x58] sm:$0xff]  ;;  %v212_v8 = vld [vmem:[%s704_s7 + $0x50] sm:$0xff]  ;;  %p558_p3 = por %p557_p2, %p556_p1 }
  0x1a   : > { %427 = vmatpush.msra.mxu2 %v217_v3  ;;  %428 = vmatpush.msra.mxu3 %v217_v3  ;;  %v211_v9 = vld [vmem:[%s704_s7 + $0x48] sm:$0xff]  ;;  %v210_v10 = vld [vmem:[%s704_s7 + $0x40] sm:$0xff]  ;;  %v209_v11 = vld [vmem:[%s704_s7 + $0x38] sm:$0xff]  ;;  %p554_p0 = pneg %p553_p13 }
  0x1b   : > { %267 = vmatpush.msra.mxu0 %v216_v4  ;;  %429 = vmatpush.msra.mxu1 %v216_v4  ;;  %v208_v12 = vld [vmem:[%s704_s7 + $0x30] sm:$0xff]  ;;  %v207_v13 = vld [vmem:[%s704_s7 + $0x28] sm:$0xff]  ;;  %v206_v14 = vld [vmem:[%s704_s7 + $0x20] sm:$0xff] }
  0x1c   : > { %430 = vmatpush.msra.mxu2 %v216_v4  ;;  %431 = vmatpush.msra.mxu3 %v216_v4  ;;  %v205_v15 = vld [vmem:[%s704_s7 + $0x18] sm:$0xff]  ;;  %v204_v16 = vld [vmem:[%s704_s7 + $0x10] sm:$0xff]  ;;  %v203_v17 = vld [vmem:[%s704_s7 + $0x8] sm:$0xff]  ;;  %p559_p5 = pnand %p558_p3, %p554_p0 }
  0x1d   : > { %268 = vmatpush.msra.mxu0 %v215_v5  ;;  %432 = vmatpush.msra.mxu1 %v215_v5  ;;  %v202_v18 = vld [vmem:[%s704_s7] sm:$0xff]  ;;  %v201_v29 = vld [vmem:[%s825_s1 + $0x38] sm:$0xff]  ;;  %v224_v31 = vld [vmem:[%s826_s2 + $0x30] sm:$0xff] }
  0x1e   : > { %433 = vmatpush.msra.mxu2 %v215_v5  ;;  %434 = vmatpush.msra.mxu3 %v215_v5  ;;  %v225_v30 = vld [vmem:[%s826_s2 + $0x38] sm:$0xff]  ;;  %v223_v32 = vld [vmem:[%s826_s2 + $0x28] sm:$0xff] }
  0x1f   : > { %269 = vmatpush.msra.mxu0 %v214_v6  ;;  %435 = vmatpush.msra.mxu1 %v214_v6 }
  0x20   : > { %436 = vmatpush.msra.mxu2 %v214_v6  ;;  %437 = vmatpush.msra.mxu3 %v214_v6 }
  0x21   : > { %270 = vmatpush.msra.mxu0 %v213_v7  ;;  %438 = vmatpush.msra.mxu1 %v213_v7 }
  0x22   : > { %439 = vmatpush.msra.mxu2 %v213_v7  ;;  %440 = vmatpush.msra.mxu3 %v213_v7 }
  0x23   : > { %271 = vmatpush.msra.mxu0 %v212_v8  ;;  %441 = vmatpush.msra.mxu1 %v212_v8 }
  0x24   : > { %442 = vmatpush.msra.mxu2 %v212_v8  ;;  %443 = vmatpush.msra.mxu3 %v212_v8 }
  0x25   : > { %272 = vmatpush.msra.mxu0 %v211_v9  ;;  %444 = vmatpush.msra.mxu1 %v211_v9 }
  0x26   : > { %445 = vmatpush.msra.mxu2 %v211_v9  ;;  %446 = vmatpush.msra.mxu3 %v211_v9 }
  0x27   : > { %273 = vmatpush.msra.mxu0 %v210_v10  ;;  %447 = vmatpush.msra.mxu1 %v210_v10 }
  0x28   : > { %448 = vmatpush.msra.mxu2 %v210_v10  ;;  %449 = vmatpush.msra.mxu3 %v210_v10 }
  0x29   : > { %274 = vmatpush.msra.mxu0 %v209_v11  ;;  %450 = vmatpush.msra.mxu1 %v209_v11 }
  0x2a   : > { %451 = vmatpush.msra.mxu2 %v209_v11  ;;  %452 = vmatpush.msra.mxu3 %v209_v11 }
  0x2b   : > { %275 = vmatpush.msra.mxu0 %v208_v12  ;;  %453 = vmatpush.msra.mxu1 %v208_v12 }
  0x2c   : > { %454 = vmatpush.msra.mxu2 %v208_v12  ;;  %455 = vmatpush.msra.mxu3 %v208_v12 }
  0x2d   : > { %276 = vmatpush.msra.mxu0 %v207_v13  ;;  %456 = vmatpush.msra.mxu1 %v207_v13 }
  0x2e   : > { %457 = vmatpush.msra.mxu2 %v207_v13  ;;  %458 = vmatpush.msra.mxu3 %v207_v13 }
  0x2f   : > { %277 = vmatpush.msra.mxu0 %v206_v14  ;;  %459 = vmatpush.msra.mxu1 %v206_v14 }
  0x30   : > { %460 = vmatpush.msra.mxu2 %v206_v14  ;;  %461 = vmatpush.msra.mxu3 %v206_v14 }
  0x31   : > { %278 = vmatpush.msra.mxu0 %v205_v15  ;;  %462 = vmatpush.msra.mxu1 %v205_v15 }
  0x32   : > { %463 = vmatpush.msra.mxu2 %v205_v15  ;;  %464 = vmatpush.msra.mxu3 %v205_v15 }
  0x33   : > { %279 = vmatpush.msra.mxu0 %v204_v16  ;;  %465 = vmatpush.msra.mxu1 %v204_v16 }
  0x34   : > { %466 = vmatpush.msra.mxu2 %v204_v16  ;;  %467 = vmatpush.msra.mxu3 %v204_v16 }
  0x35   : > { %280 = vmatpush.msra.mxu0 %v203_v17  ;;  %468 = vmatpush.msra.mxu1 %v203_v17 }
  0x36   : > { %469 = vmatpush.msra.mxu2 %v203_v17  ;;  %470 = vmatpush.msra.mxu3 %v203_v17 }
  0x37   : > { %281 = vmatpush.msra.mxu0 %v202_v18  ;;  %471 = vmatpush.msra.mxu1 %v202_v18 }
  0x38   : > { %472 = vmatpush.msra.mxu2 %v202_v18  ;;  %473 = vmatpush.msra.mxu3 %v202_v18 }
  0x39   : > { %282 = vmatmul.f32.vlgmr.msra.gmra.mxu0 %v194_v19  ;;  %288 = vmatmul.f32.vlgmr.msra.gmra.mxu1 %v196_v20 }
  0x3a   : > { %294 = vmatmul.f32.vlgmr.msra.gmra.mxu2 %v198_v21  ;;  %300 = vmatmul.f32.vlgmr.msra.gmra.mxu3 %v200_v22 }
  0x3b   : > { %243 = vperm.xlu1 %533, %v221_v23   ;;  %233 = vperm.xlu0 %532, %v219_v24  }
  0x3c   : > { %253 = vperm.xlu2 %534, %v223_v32  }
  0x41   : > { %285 = vmatmul.f32.gmra.mxu0 %v195_v26  ;;  %291 = vmatmul.f32.gmra.mxu1 %v197_v27 }
  0x42   : > { %297 = vmatmul.f32.gmra.mxu2 %v199_v28  ;;  %303 = vmatmul.f32.gmra.mxu3 %v201_v29 }
  0x43   : > { %263 = vperm.xlu1 %533, %v225_v30   ;;  %258 = vperm.xlu0 %532, %v224_v31  }
  0x72   : > { %v249_v41 = vpop.permute.xlu2 %248 }
  0x88   : > { %v229_v33 = vpop.permute.xlu0 %228  ;;  %v239_v34 = vpop.permute.xlu1 %238 }
  0x96   : > { %v254_v52 = vpop.permute.xlu2 %253 }
  0xad   : > { %v234_v35 = vpop.permute.xlu0 %233  ;;  %v244_v40 = vpop.permute.xlu1 %243 }
  0xb5   : > { %v259_v42 = vpop.permute.xlu0 %258  ;;  %v264_v51 = vpop.permute.xlu1 %263 }
  0xb6   : > { %v283_v36 = vpop.f32.mrf.mxu0  ;;  %v289_v37 = vpop.f32.mrf.mxu1 }
  0xb7   : > { %v284_v38 = vadd.f32 %v283_v36, %v229_v33  ;;  %v290_v39 = vadd.f32 %v289_v37, %v239_v34 }
  0xb9   : > { %308 = vst.msk [vmem:[%s767_s4] sm:$0xff] %vm307_vm0, %v284_v38 }
  0xba   : > { %310 = vst.msk [vmem:[%s767_s4 + $0x10] sm:$0xff] %vm307_vm0, %v290_v39 }
  0xbd   : > { %v295_v43 = vpop.f32.mrf.mxu2  ;;  %v301_v44 = vpop.f32.mrf.mxu3 }
  0xbe   : > { %v296_v45 = vadd.f32 %v295_v43, %v249_v41  ;;  %v302_v46 = vadd.f32 %v301_v44, %v259_v42  ;;  %v286_v47 = vpop.f32.mrf.mxu0  ;;  %v292_v48 = vpop.f32.mrf.mxu1 }
  0xbf   : > { %v287_v49 = vadd.f32 %v286_v47, %v234_v35  ;;  %v293_v50 = vadd.f32 %v292_v48, %v244_v40 }
  0xc0   : > { %312 = vst.msk [vmem:[%s767_s4 + $0x20] sm:$0xff] %vm307_vm0, %v296_v45 }
  0xc1   : > { %314 = vst.msk [vmem:[%s767_s4 + $0x30] sm:$0xff] %vm307_vm0, %v302_v46 }
  0xc2   : > { %309 = vst.msk [vmem:[%s767_s4 + $0x8] sm:$0xff] %vm307_vm0, %v287_v49 }
  0xc3   : > { %311 = vst.msk [vmem:[%s767_s4 + $0x18] sm:$0xff] %vm307_vm0, %v293_v50 }
  0xc5   : > { %v298_v53 = vpop.f32.mrf.mxu2  ;;  %v304_v54 = vpop.f32.mrf.mxu3 }
  0xc6   : > { %v299_v55 = vadd.f32 %v298_v53, %v254_v52  ;;  %v305_v56 = vadd.f32 %v304_v54, %v264_v51 }
  0xc8   : > { %313 = vst.msk [vmem:[%s767_s4 + $0x28] sm:$0xff] %vm307_vm0, %v299_v55 }
  0xc9   : > { %315 = vst.msk [vmem:[%s767_s4 + $0x38] sm:$0xff] %vm307_vm0, %v305_v56 }
  0xca   : > { %562 = shalt.err (!%p559_p5)
}
  0xcb   : > { %s616_s28 = smov 128   ;;  %s617_s29 = smov 8  }
  0xcc   : > { %474 = dma.vmem_to_hbm [thread:$0]  (%p678_p4), %s331_s15, 1024, %s333_s9, %s317_s10, %s616_s28, %s616_s28, %s617_s29  }
  0xcd PF: > { %p480_p6 = scmp.ge.s32.totalorder %s613_s17, 2  ;;  %s347_s30 = sand.u32 1, %s593_s12  }
  0xce   : > { %s348_s4 = scalar_lea.sflag [#allocation3], %s347_s30 }
  0xcf   : > { %p477_p7 = pnand %p480_p6, %p685_p8 }
  0xd1   : > { %p478_p9 = pneg %p477_p7 }
  0xd3   : > { %588 = dma.done.wait (%p478_p9), %s348_s4, 1024  }
  0xd4   : > { %590 = vsyncadd (%p478_p9), %s348_s4, 4294966272  ;;  %s16_s17 = sadd.s32 1, %s613_s17   ;;  %s830_s12 = smov %s597_s13 }
  0xd5   : > { %p13_p10 = scmp.ge.s32.totalorder %s16_s17, 4   ;;  %s831_s13 = smov %s601_s14 }
  0xd6   : > { %s832_s14 = smov %s691_s25  ;;  %s833_s15 = smov %s609_s16 }
  0xd7   : > { %s834_s16 = smov %s836_s20  ;;  %15 = sbr.rel (!%p13_p10) target bundleno = 4 (0x4), region = 67 }
  0xdc   :  { %354 = vsyncpa [#allocation3], 1 }
  0xdd   :  { %356 = vsyncpa [#allocation3 + $0x1], 1 }

</bundles_post_ra>
